<compile_context>
chip_gen: v6e
topology: v6e:2x2x1
jax: 0.10.0
libtpu: 0.0.40
codegen_flags: <defaults>
</compile_context>

<pallas_src>
import jax
import jax.numpy as jnp
from jax.experimental import pallas as pl
from jax.experimental.pallas import tpu as pltpu

FEATURE_TYPES = ("float", "int", "array")


def _dma_identity_kernel(x_hbm_ref, o_hbm_ref, sem):
    # Whole-array HBM->HBM DMA: the DMA engine streams the bytes directly,
    # skipping VMEM staging and the TensorCore entirely.
    cp = pltpu.make_async_copy(x_hbm_ref, o_hbm_ref, sem)
    cp.start()
    cp.wait()


@jax.jit
def _pallas_identity_copy(x: jax.Array) -> jax.Array:
    """Exact copy of `x` performed by a single Pallas HBM->HBM DMA."""
    return pl.pallas_call(
        _dma_identity_kernel,
        out_shape=jax.ShapeDtypeStruct(x.shape, x.dtype),
        in_specs=[pl.BlockSpec(memory_space=pl.ANY)],    # raw HBM ref, no auto-DMA
        out_specs=pl.BlockSpec(memory_space=pl.ANY),     # raw HBM ref, no auto-DMA
        scratch_shapes=[pltpu.SemaphoreType.DMA(())],
    )(x)


def float_feature_forward(feature: jax.Array, in_dim: int = 1,
                          use_pallas: bool = False) -> jax.Array:
    """_forward_check + identity return of FloatFeatureColumn.forward.

    use_pallas=False (default): zero-cost identity return (optimal).
    use_pallas=True: parity/benchmark path -- one whole-array DMA copy on device.
    """
    # Explicit raises (not asserts) so validation survives `python -O`.
    if feature.ndim != 2:
        raise ValueError(f"feature must be rank-2, got shape {feature.shape}")
    if feature.shape[1] != in_dim:
        raise ValueError(
            f"feature.shape[1] ({feature.shape[1]}) != in_dim ({in_dim})")

    if not use_pallas:
        # Optimal path: validated identity requires no device work at all.
        return feature

    return _pallas_identity_copy(feature)


class FloatFeatureColumn:
    """JAX/Pallas port of the PyTorch FloatFeatureColumn (identity feature column)."""

    def __init__(self, fea_name: str, fea_type: str = "float",
                 fea_space_size: int = -1, in_dim: int = 1,
                 out_dim: int = 1, padding_idx: int = -1):
        if fea_type not in FEATURE_TYPES:
            raise ValueError("Illegal `fea_type` value.")
        if fea_type != "float":
            raise ValueError("FloatFeatureColumn requires fea_type == 'float'")
        self.name = fea_name
        self.type = fea_type
        self.space_size = None
        # 'float' type -> in_dim = out_dim = 1 (per the PyTorch base class logic).
        self.in_dim = 1
        self.out_dim = 1
        # No learnable parameters for this column type.

    def __call__(self, feature: jax.Array, use_pallas: bool = False) -> jax.Array:
        return float_feature_forward(feature, in_dim=self.in_dim,
                                     use_pallas=use_pallas)


if __name__ == "__main__":
    key = jax.random.PRNGKey(0)
    col = FloatFeatureColumn(fea_name="price", fea_type="float")

    # Small case matching the module's (batch, in_dim=1) contract.
    batch = 8
    feature = jax.random.normal(key, (batch, 1), dtype=jnp.float32)

    # Default fast path: pure identity, no device work.
    out_fast = jax.block_until_ready(col(feature))
    assert out_fast.shape == feature.shape and out_fast.dtype == feature.dtype
    assert bool(jnp.all(out_fast == feature))

    # Pallas parity path: single HBM->HBM DMA copy.
    out_kernel = jax.block_until_ready(col(feature, use_pallas=True))
    assert out_kernel.shape == feature.shape and out_kernel.dtype == feature.dtype
    assert bool(jnp.all(out_kernel == feature))

    # Odd batch size (not a multiple of 8/128): no padding needed anymore.
    key2 = jax.random.PRNGKey(0)
    feature2 = jax.random.normal(key2, (300, 1), dtype=jnp.float32)
    out_kernel2 = jax.block_until_ready(col(feature2, use_pallas=True))
    assert out_kernel2.shape == feature2.shape and out_kernel2.dtype == feature2.dtype
    assert bool(jnp.all(out_kernel2 == feature2))

    print("KERNEL_OK")
</pallas_src>

<mosaic_0001>
module attributes {stable_mosaic.version = 11 : i64} {
  func.func @_dma_identity_kernel(%arg0: memref<8x1xf32, #tpu.memory_space<any>>, %arg1: memref<8x1xf32, #tpu.memory_space<any>>, %arg2: memref<!tpu.dma_semaphore, #tpu.memory_space<semaphore_mem>>) attributes {dimension_semantics = [], scalar_prefetch = 0 : i64, scratch_operands = 1 : i64, tpu.core_type = #tpu.core_type<tc>} {
    tpu.enqueue_dma source(%arg0 : memref<8x1xf32, #tpu.memory_space<any>>) target(%arg1 : memref<8x1xf32, #tpu.memory_space<any>>) target_semaphore(%arg2 : memref<!tpu.dma_semaphore, #tpu.memory_space<semaphore_mem>>)
    tpu.wait_dma2 semaphore(%arg2 : memref<!tpu.dma_semaphore, #tpu.memory_space<semaphore_mem>>) src(%arg0 : memref<8x1xf32, #tpu.memory_space<any>>) dst(%arg1 : memref<8x1xf32, #tpu.memory_space<any>>)
    return
  }
}

</mosaic_0001>

<bundles_post_ra>
// kernel: _pallas_identity_copy.1
= control target key start
LH: loop header
LB: loop body
LE: loop exit
PB: predicated region body
PF: predicated region fallthrough
CT: control target
= control target key end

     0   :  { %s85_s0 = inlined_call_operand.vmem [shape: f32[8,1], index: 0, kind: input, shape index: {}]   ;;  %s86_s1 = inlined_call_operand.vmem [shape: f32[8,1], index: 1, kind: output, shape index: {}]  }
   0x1   :  { %v39_v0 = vld [vmem:[%s85_s0] sm:$0xff] }
   0x2   :  { %40 = vst [vmem:[%s86_s1] sm:$0xff] %v39_v0 }
   0x3   :  { %48 = vsyncadd [#allocation2], 128 }
   0x4   :  { %67 = dma.done.wait [#allocation2], 128 }
   0x5   :  { %68 = vsyncadd [#allocation2], 4294967168 }
   0x6   :  { %52 = vsyncmov [#allocation2] }
   0x9   :  { %s53_s10 = vpop.sfrf %52 }
   0xa   :  { %p66_p0 = scmp.ne.s32.totalorder %s53_s10, 0 }
   0xc   :  { %57 = shalt.err (%p66_p0)  }

</bundles_post_ra>
